<compile_context>
chip_gen: v5e
topology: v5e:2x2
jax: 0.10.0
libtpu: 0.0.40
codegen_flags: <defaults>
</compile_context>

<pallas_src>
import jax
import jax.numpy as jnp
from jax.experimental import pallas as pl
from jax.experimental.pallas import tpu as pltpu

H, W = 28, 28
PIX = H * W                      # 784
GROUP = 8                        # images folded into the lane dim (8*784 = 49*128)
MAX_TILE_BYTES = 2048 * PIX * 4  # ~6.1 MiB per block (2048 images worth of f32)


# ----------------------------------------------------------------------------
# TF-IDF weight computation (deterministic, synthetic "dataset" in-script).
# Mirrors compute_tfidf_weights() from the PyTorch reference.
# ----------------------------------------------------------------------------
def compute_tfidf_weights(data):
    # data: (num_images, 784) float32 in [0, 1]
    num_images = data.shape[0]
    tf = data.mean(axis=0)                                   # (784,)
    df = (data > 0).sum(axis=0).astype(jnp.float32)          # (784,)
    idf = jnp.log(num_images / (df + 1.0))                   # (784,)
    tf_idf = tf * idf
    rng = tf_idf.max() - tf_idf.min()
    tf_idf_norm = (tf_idf - tf_idf.min()) / jnp.maximum(rng, 1e-8)
    return tf_idf_norm.reshape(-1)                           # (784,)


# ----------------------------------------------------------------------------
# Pallas kernel: row-tiled broadcasted elementwise multiply.
# ----------------------------------------------------------------------------
def tfidf_mul_kernel(x_ref, w_ref, o_ref):
    # x_ref: (TILE_ROWS, LANES) tile of the (reshaped) batch
    # w_ref: (1, LANES) resident weights, broadcast over the sublane dim
    # o_ref: (TILE_ROWS, LANES)
    o_ref[...] = x_ref[...] * w_ref[...]


def _round_up(v, m):
    return ((v + m - 1) // m) * m


def _mul_2d(x2d, w2d):
    """x2d: (rows, lanes) f32; w2d: (1, lanes) f32 -> (rows, lanes)."""
    rows, lanes = x2d.shape

    # Largest sublane-aligned tile within the per-block byte budget.
    max_tile_rows = max(GROUP, (MAX_TILE_BYTES // (lanes * 4)) // GROUP * GROUP)
    # Keep >= ~4 grid steps when the batch allows it (megacore sharding on v7x,
    # and keeps the double-buffer pipeline overlapped).
    tile_rows = min(max_tile_rows, max(GROUP, _round_up(pl.cdiv(rows, 4), GROUP)))
    grid = (pl.cdiv(rows, tile_rows),)

    cost = pl.CostEstimate(
        flops=rows * lanes,
        transcendentals=0,
        bytes_accessed=2 * rows * lanes * 4 + lanes * 4,
    )

    return pl.pallas_call(
        tfidf_mul_kernel,
        out_shape=jax.ShapeDtypeStruct((rows, lanes), x2d.dtype),
        grid=grid,
        in_specs=[
            pl.BlockSpec((tile_rows, lanes), lambda i: (i, 0)),  # x: TILE rows/step
            pl.BlockSpec((1, lanes), lambda i: (0, 0)),          # w: resident block
        ],
        out_specs=pl.BlockSpec((tile_rows, lanes), lambda i: (i, 0)),
        compiler_params=pltpu.CompilerParams(
            dimension_semantics=("parallel",),
            vmem_limit_bytes=48 << 20,
        ),
        cost_estimate=cost,
    )(x2d, w2d)


def tfidf_weighted_layer(x_nchw, tfidf_weights):
    """x_nchw: (N, 1, 28, 28) f32;  tfidf_weights: (784,) f32 -> (N, 1, 28, 28)."""
    n = x_nchw.shape[0]

    if n % GROUP == 0 and n > 0:
        # Lane-dense path: fold 8 images into the lane dim -> last dim 6272 = 49*128.
        rows, lanes = n // GROUP, PIX * GROUP
        x2d = x_nchw.reshape(rows, lanes)                       # free row-major view
        w2d = jnp.tile(tfidf_weights.reshape(1, PIX), (1, GROUP))
    else:
        # Fallback for ragged batches: original (N, 784) layout (no extra pad copy).
        rows, lanes = n, PIX
        x2d = x_nchw.reshape(rows, lanes)
        w2d = tfidf_weights.reshape(1, PIX)

    out2d = _mul_2d(x2d, w2d)
    return out2d.reshape(n, 1, H, W)


if __name__ == "__main__":
    key = jax.random.PRNGKey(0)
    k_data, k_x, k_x2, k_x3 = jax.random.split(key, 4)

    # Deterministic synthetic "MNIST-like" dataset for the TF-IDF buffer.
    num_images = 64
    fake_dataset = jax.random.uniform(k_data, (num_images, PIX), dtype=jnp.float32)
    # Make some pixels exactly zero so df varies across pixels (like MNIST).
    fake_dataset = jnp.where(fake_dataset < 0.3, 0.0, fake_dataset)
    tfidf_w = compute_tfidf_weights(fake_dataset)            # (784,)
    w_ref4d = tfidf_w.reshape(1, 1, H, W)

    # Small example input, batch=2 (ragged path), NCHW, normalized like the transform.
    batch = 2
    x = jax.random.uniform(k_x, (batch, 1, H, W), dtype=jnp.float32)
    x = (x - 0.5) / 0.5
    out = jax.block_until_ready(tfidf_weighted_layer(x, tfidf_w))
    assert out.shape == (batch, 1, H, W)
    assert jnp.allclose(out, x * w_ref4d, atol=1e-6), "mismatch (batch=2)"

    # Multiple-of-8 batch: exercises the lane-dense (N//8, 6272) path.
    batch2 = 64
    x2 = jax.random.uniform(k_x2, (batch2, 1, H, W), dtype=jnp.float32)
    x2 = (x2 - 0.5) / 0.5
    out2 = jax.block_until_ready(tfidf_weighted_layer(x2, tfidf_w))
    assert out2.shape == (batch2, 1, H, W)
    assert jnp.allclose(out2, x2 * w_ref4d, atol=1e-6), "mismatch (batch=64)"

    # Ragged larger batch: fallback path with multiple grid steps + partial tail block.
    batch3 = 1037
    x3 = jax.random.uniform(k_x3, (batch3, 1, H, W), dtype=jnp.float32)
    x3 = (x3 - 0.5) / 0.5
    out3 = jax.block_until_ready(tfidf_weighted_layer(x3, tfidf_w))
    assert out3.shape == (batch3, 1, H, W)
    assert jnp.allclose(out3, x3 * w_ref4d, atol=1e-6), "mismatch (batch=1037)"

    print("KERNEL_OK")
</pallas_src>

<mosaic_0001>
module attributes {stable_mosaic.version = 11 : i64} {
  func.func @tfidf_mul_kernel(%arg0: i32, %arg1: memref<8x784xf32, #tpu.memory_space<vmem>>, %arg2: memref<1x784xf32, #tpu.memory_space<vmem>>, %arg3: memref<8x784xf32, #tpu.memory_space<vmem>>) attributes {dimension_semantics = [#tpu.dimension_semantics<parallel>], iteration_bounds = array<i64: 1>, scalar_prefetch = 0 : i64, scratch_operands = 0 : i64, tpu.core_type = #tpu.core_type<tc>, window_params = [{transform_indices = @transform_0, window_bounds = array<i64: 8, 784>}, {pipeline_mode = #tpu.pipeline_mode<synchronous>, transform_indices = @transform_1, window_bounds = array<i64: 1, 784>}, {transform_indices = @transform_2, window_bounds = array<i64: 8, 784>}]} {
    %c0 = arith.constant 0 : index
    %c0_0 = arith.constant 0 : index
    %0 = vector.load %arg1[%c0, %c0_0] : memref<8x784xf32, #tpu.memory_space<vmem>>, vector<8x784xf32>
    %c0_1 = arith.constant 0 : index
    %c0_2 = arith.constant 0 : index
    %1 = vector.load %arg2[%c0_1, %c0_2] : memref<1x784xf32, #tpu.memory_space<vmem>>, vector<1x784xf32>
    %2 = vector.broadcast %1 : vector<1x784xf32> to vector<8x784xf32>
    %3 = arith.mulf %0, %2 : vector<8x784xf32>
    %c0_3 = arith.constant 0 : index
    %c0_4 = arith.constant 0 : index
    %4 = vector.load %arg3[%c0_3, %c0_4] : memref<8x784xf32, #tpu.memory_space<vmem>>, vector<8x784xf32>
    tpu.vector_store %arg3[%c0_3, %c0_4], %3 {strides = array<i32>} : memref<8x784xf32, #tpu.memory_space<vmem>>, vector<8x784xf32>,
    return
  }
  func.func @transform_0(%arg0: i32) -> (i32, i32) {
    %c0_i32 = arith.constant 0 : i32
    %c0_i32_0 = arith.constant 0 : i32
    return %arg0, %c0_i32 : i32, i32
  }
  func.func @transform_1(%arg0: i32) -> (i32, i32) {
    %c0_i32 = arith.constant 0 : i32
    %c0_i32_0 = arith.constant 0 : i32
    %c0_i32_1 = arith.constant 0 : i32
    return %c0_i32, %c0_i32_0 : i32, i32
  }
  func.func @transform_2(%arg0: i32) -> (i32, i32) {
    %c0_i32 = arith.constant 0 : i32
    %c0_i32_0 = arith.constant 0 : i32
    return %arg0, %c0_i32 : i32, i32
  }
}

</mosaic_0001>

<bundles_post_ra>
// kernel: tpu_custom_call.1
= control target key start
LH: loop header
LB: loop body
LE: loop exit
PB: predicated region body
PF: predicated region fallthrough
CT: control target
= control target key end

     0   :  { %7 = vsyncpa [#allocation3], 0  ;;  %s295_s0 = inlined_call_operand.hbm [shape: f32[2,784], index: 0, kind: input, shape index: {}]   ;;  %s296_s1 = inlined_call_operand.hbm [shape: f32[1,784], index: 1, kind: input, shape index: {}]   ;;  %s297_s2 = inlined_call_operand.hbm [shape: f32[2,784], index: 2, kind: output, shape index: {}]  }
   0x1   :  { %8 = vsyncpa [#allocation6], 0 }
   0x2   :  { %9 = vsyncpa [#allocation4], 0 }
   0x3   :  { %13 = vsyncadd [#allocation3], 672  ;;  %s14_s11 = sshll.u32 %s295_s0, 4  ;;  %s226_s12 = smov [#allocation2]   ;;  %s15_s11 = int_to_ptr.hbm [resolvable:$true] %s14_s11 }
   0x4   :  { %s16_s13 = sshll.u32 %s226_s12, 4  ;;  %s28_s16 = sshll.u32 %s296_s1, 4  ;;  %s17_s13 = int_to_ptr.vmem [resolvable:$true] %s16_s13  ;;  %s29_s16 = int_to_ptr.hbm [resolvable:$true] %s28_s16 }
   0x5   :  { %s227_s17 = smov 224   ;;  %s228_s18 = smov 14  }
   0x6   :  { %22 = dma.hbm_to_vmem [thread:$0]  %s15_s11, 224, %s17_s13, [#allocation3], %s227_s17, %s227_s17, %s228_s18  }
   0x7   :  { %s229_s19 = smov [#allocation5]  }
   0x8   :  { %s30_s20 = sshll.u32 %s229_s19, 4  ;;  %s31_s20 = int_to_ptr.vmem [resolvable:$true] %s30_s20 }
   0x9   :  { %33 = dma.hbm_to_vmem [thread:$0]  %s29_s16, 112, %s31_s20, [#allocation6]  }
   0xa   :  { %220 = dma.done.wait [#allocation3], 896  }
   0xb   :  { %221 = vsyncadd [#allocation3], 4294966400 }
   0xc   :  { %222 = dma.done.wait [#allocation6], 112  }
   0xd   :  { %223 = vsyncadd [#allocation6], 4294967184  ;;  %v50_v0 = vld [vmem:[#allocation5] sm:$0x7f]  ;;  %vm64_vm0 = vcmask 1041408   ;;  %vm66_vm1 = vcmask 1045508  }
   0xe   :  { %vm72_vm2 = vcmask 1043458   ;;  %v52_v1 = vperm.slane %v50_v0, 0  ;;  %v53_v2 = vperm.slane %v50_v0, 1  ;;  %v54_v3 = vperm.slane %v50_v0, 2  ;;  %v42_v11 = vld [vmem:[#allocation2] sm:$0xff]  ;;  %v44_v21 = vld [vmem:[#allocation2 + $0xe] sm:$0xff] }
   0xf   :  { %v55_v4 = vperm.slane %v50_v0, 3  ;;  %v56_v5 = vperm.slane %v50_v0, 4  ;;  %v57_v6 = vperm.slane %v50_v0, 5  ;;  %v58_v7 = vperm.slane %v50_v0, 6  ;;  %vm113_vm6 = vmor %vm72_vm2, %vm64_vm0  ;;  %v43_v16 = vld [vmem:[#allocation2 + $0x8] sm:$0x3f] }
  0x10   :  { %vm74_vm3 = vcmask 1045504   ;;  %v59_v8 = vrot.slane %v53_v2, 6  ;;  %v60_v9 = vrot.slane %v54_v3, 4  ;;  %vm76_vm4 = vcmask 1045506   ;;  %v45_v28 = vld [vmem:[#allocation2 + $0x16] sm:$0x3f] }
  0x11   :  { %v61_v10 = vrot.slane %v55_v4, 2  ;;  %vm68_vm5 = vcmask 1043456   ;;  %v62_v12 = vrot.slane %v57_v6, 6  ;;  %v63_v13 = vrot.slane %v58_v7, 4  ;;  %v46_v35 = vld [vmem:[#allocation2 + $0x1c] sm:$0xff]  ;;  %v48_v45 = vld [vmem:[#allocation2 + $0x2a] sm:$0xff] }
  0x12   :  { %vm114_vm7 = vcmask 128004   ;;  %v65_v14 = vsel %vm64_vm0, %v52_v1, %v59_v8  ;;  %v73_v17 = vsel %vm72_vm2, %v52_v1, %v59_v8  ;;  %v82_v32 = vsel %vm66_vm1, %v52_v1, %v59_v8  ;;  %v47_v41 = vld [vmem:[#allocation2 + $0x24] sm:$0x3f]  ;;  %v49_v50 = vld [vmem:[#allocation2 + $0x32] sm:$0x3f] }
  0x13   :  { %v67_v15 = vsel %vm66_vm1, %v60_v9, %v61_v10  ;;  %v75_v18 = vsel %vm74_vm3, %v61_v10, %v60_v9  ;;  %v70_v20 = vsel %vm64_vm0, %v56_v5, %v62_v12  ;;  %v79_v23 = vsel %vm72_vm2, %v56_v5, %v62_v12  ;;  %vm266_vm8 = vmor %vm114_vm7, %vm113_vm6 }
  0x14   :  { %v69_v19 = vsel %vm68_vm5, %v65_v14, %v67_v15  ;;  %v77_v22 = vsel %vm76_vm4, %v73_v17, %v75_v18  ;;  %v71_v25 = vsel %vm68_vm5, %v70_v20, %v63_v13  ;;  %v80_v29 = vsel %vm76_vm4, %v79_v23, %v63_v13 }
  0x15   :  { %v104_v24 = vmul.f32 %v69_v19, %v42_v11  ;;  %v78_v27 = vrot.slane %v77_v22, 2  ;;  %v105_v30 = vmul.f32 %v71_v25, %v43_v16  ;;  %v81_v31 = vrot.slane %v80_v29, 2 }
  0x16   :  { %v83_v33 = vsel %vm64_vm0, %v60_v9, %v61_v10  ;;  %v86_v37 = vsel %vm66_vm1, %v56_v5, %v62_v12  ;;  %v89_v38 = vsel %vm74_vm3, %v59_v8, %v52_v1  ;;  %v90_v43 = vsel %vm72_vm2, %v60_v9, %v61_v10 }
  0x17   :  { %112 = vst [vmem:[#allocation7] sm:$0xff] %v104_v24  ;;  %v106_v34 = vmul.f32 %v78_v27, %v44_v21  ;;  %v84_v36 = vsel %vm68_vm5, %v83_v33, %v82_v32  ;;  %v107_v39 = vmul.f32 %v81_v31, %v45_v28  ;;  %v87_v42 = vsel %vm68_vm5, %v63_v13, %v86_v37 }
  0x18   :  { %116 = vst.msk [vmem:[#allocation7 + $0x8] sm:$0x3f] %vm266_vm8, %v105_v30  ;;  %v85_v40 = vrot.slane %v84_v36, 4  ;;  %v88_v44 = vrot.slane %v87_v42, 4  ;;  %v91_v46 = vsel %vm76_vm4, %v90_v43, %v89_v38  ;;  %v93_v47 = vsel %vm74_vm3, %v62_v12, %v56_v5 }
  0x19   :  { %117 = vst [vmem:[#allocation7 + $0xe] sm:$0xff] %v106_v34  ;;  %v92_v49 = vrot.slane %v91_v46, 6  ;;  %v94_v51 = vsel %vm76_vm4, %v63_v13, %v93_v47 }
  0x1a   :  { %118 = vst.msk [vmem:[#allocation7 + $0x16] sm:$0x3f] %vm266_vm8, %v107_v39  ;;  %v108_v48 = vmul.f32 %v85_v40, %v46_v35  ;;  %v109_v52 = vmul.f32 %v88_v44, %v47_v41  ;;  %v95_v53 = vrot.slane %v94_v51, 6 }
  0x1b   :  { %v110_v54 = vmul.f32 %v92_v49, %v48_v45 }
  0x1c   :  { %119 = vst [vmem:[#allocation7 + $0x1c] sm:$0xff] %v108_v48  ;;  %v111_v55 = vmul.f32 %v95_v53, %v49_v50 }
  0x1d   :  { %120 = vst.msk [vmem:[#allocation7 + $0x24] sm:$0x3f] %vm266_vm8, %v109_v52 }
  0x1e   :  { %121 = vst [vmem:[#allocation7 + $0x2a] sm:$0xff] %v110_v54 }
  0x1f   :  { %122 = vst.msk [vmem:[#allocation7 + $0x32] sm:$0x3f] %vm266_vm8, %v111_v55 }
  0x20   :  { %126 = vsyncadd [#allocation4], 672  ;;  %s129_s21 = sshll.u32 %s297_s2, 4  ;;  %s230_s22 = smov [#allocation7]   ;;  %s130_s21 = int_to_ptr.hbm [resolvable:$true] %s129_s21 }
  0x21   :  { %s127_s23 = sshll.u32 %s230_s22, 4  ;;  %s128_s23 = int_to_ptr.vmem [resolvable:$true] %s127_s23 }
  0x22   :  { %135 = dma.vmem_to_hbm [thread:$0]  %s128_s23, 224, %s130_s21, [#allocation4], %s227_s17, %s227_s17, %s228_s18  }
  0x23   :  { %224 = dma.done.wait [#allocation4], 896  }
  0x24   :  { %225 = vsyncadd [#allocation4], 4294966400 }
  0x25   :  { %140 = vsyncpa [#allocation3], 1 }
  0x26   :  { %141 = vsyncpa [#allocation6], 1 }
  0x27   :  { %142 = vsyncpa [#allocation4], 1 }

</bundles_post_ra>
